<compile_context>
chip_gen: v7x
topology: tpu7x:2x2x1
jax: 0.10.0
libtpu: 0.0.40
codegen_flags: <defaults>
</compile_context>

<pallas_src>
import functools

import jax
import jax.numpy as jnp
from jax.experimental import pallas as pl
from jax.experimental.pallas import tpu as pltpu

_BN_EPS = 1e-5


# --------------------------------------------------------------------------- fused kernel

def _local_agg_kernel(H, W, S, x_ref, w0_ref, b0_ref, wd_ref, w1_ref, b1_ref, o_ref,
                      pad_ref):
    """One image: pw-conv0(+BN0 folded) -> depthwise 3x3 (pad=1) -> pw-conv1(+BN1 folded)."""
    C = x_ref.shape[-1]
    M = H * W
    SW = S * W
    n_strips = H // S

    # ---- pointwise conv 0 (+ folded BN0): one (M, C) @ (C, C) MXU GEMM, f32 accumulation.
    h0 = jnp.dot(x_ref[...].reshape(M, C), w0_ref[...],
                 preferred_element_type=jnp.float32) + b0_ref[...]

    # ---- H-haloed bf16 scratch.  Zero ONLY the two halo rows (done every grid step --
    #      never gated on program_id, so it is megacore-safe), then store h0 into rows
    #      [1, H+1).  Every store here is bf16-tile aligned ((W, C) = one (16, 128) tile).
    zero_row = jnp.zeros((1, W, C), jnp.bfloat16)
    pad_ref[pl.ds(0, 1)] = zero_row
    pad_ref[pl.ds(H + 1, 1)] = zero_row
    pad_ref[pl.ds(1, H)] = h0.reshape(H, W, C).astype(jnp.bfloat16)

    # Column masks for the +/-1 W-direction taps (hoisted; identical for every strip).
    col = jax.lax.broadcasted_iota(jnp.int32, (SW, 1), 0) % W
    has_left = col != 0            # output column j has a real left neighbour (j - 1)
    has_right = col != (W - 1)     # output column j has a real right neighbour (j + 1)

    # ---- depthwise 3x3 (padding=1) + pointwise conv 1 (+ folded BN1), strip-mined over H
    #      so the live f32 accumulator is only (S*W, C).
    def strip_body(s, carry):
        r0 = s * S                                                # first output row of strip
        # One aligned load of the S+2 haloed rows for this strip; the three u-shifted slabs
        # below are tile-aligned value slices of it (offsets are multiples of W = 16 rows).
        rows = pad_ref[pl.ds(r0, S + 2)].reshape((S + 2) * W, C)  # bf16
        acc = jnp.zeros((SW, C), jnp.float32)
        for u in range(3):                                        # static unroll over dy
            slab = rows[u * W:u * W + SW].astype(jnp.float32)     # h0[r0 + u - 1 + i, j]
            # centre tap (v = 1)
            acc = acc + slab * wd_ref[3 * u + 1]
            # left-neighbour tap (v = 0): needs value from column j-1.  The shift is done
            # in-register (sublane slice+concat on the XLU); the wrapped row is masked.
            left = jnp.roll(slab, 1, axis=0)
            acc = acc + jnp.where(has_left, left, 0.0) * wd_ref[3 * u + 0]
            # right-neighbour tap (v = 2): value from column j+1.
            right = jnp.roll(slab, -1, axis=0)
            acc = acc + jnp.where(has_right, right, 0.0) * wd_ref[3 * u + 2]
        # ---- pointwise conv 1 (+ folded BN1) for this strip.
        y = jnp.dot(acc.astype(jnp.bfloat16), w1_ref[...],
                    preferred_element_type=jnp.float32) + b1_ref[...]
        o_ref[0, pl.ds(s, 1)] = y.astype(o_ref.dtype).reshape(1, SW, C)
        return carry

    jax.lax.fori_loop(0, n_strips, strip_body, None)


# ------------------------------------------------------------------------------ wrappers

def local_agg_forward_nhwc(params, x_nhwc):
    """NHWC fast path: (N, H, W, C) -> (N, H, W, C) bf16.  No layout transposes."""
    N, H, W, C = x_nhwc.shape
    M = H * W
    S = 4 if H % 4 == 0 else (2 if H % 2 == 0 else 1)    # depthwise strip rows
    n_strips = H // S

    x = x_nhwc.reshape(N, M, C).astype(jnp.bfloat16)
    kernel = functools.partial(_local_agg_kernel, H, W, S)
    out = pl.pallas_call(
        kernel,
        grid=(N,),
        in_specs=[
            pl.BlockSpec((1, M, C), lambda n: (n, 0, 0)),        # activations (lane-dense C)
            pl.BlockSpec((C, C), lambda n: (0, 0)),              # w0 (bf16)
            pl.BlockSpec((1, C), lambda n: (0, 0)),              # b0 (f32)
            pl.BlockSpec((9, C), lambda n: (0, 0)),              # depthwise taps (f32)
            pl.BlockSpec((C, C), lambda n: (0, 0)),              # w1 (bf16)
            pl.BlockSpec((1, C), lambda n: (0, 0)),              # b1 (f32)
        ],
        # 4-D output block so per-strip stores index a leading (untiled) dim only.
        out_specs=pl.BlockSpec((1, n_strips, S * W, C), lambda n: (n, 0, 0, 0)),
        out_shape=jax.ShapeDtypeStruct((N, n_strips, S * W, C), jnp.bfloat16),
        scratch_shapes=[pltpu.VMEM((H + 2, W, C), jnp.bfloat16)],   # H-haloed dw buffer
        compiler_params=pltpu.CompilerParams(
            dimension_semantics=("parallel",),                   # images split across TCs
            vmem_limit_bytes=32 * 1024 * 1024,                   # tiny footprint; v7x headroom
        ),
    )(x, params["w0"], params["b0"], params["wd"], params["w1"], params["b1"])
    return out.reshape(N, H, W, C)


def local_agg_forward(params, x_nchw):
    """NCHW wrapper matching the PyTorch module interface: (N, C, H, W) f32 -> f32."""
    # TODO(synk): in an end-to-end NHWC/bf16 model call local_agg_forward_nhwc directly --
    # these two transposes plus the f32 upcast move more HBM bytes than the kernel itself.
    x_nhwc = jnp.transpose(x_nchw, (0, 2, 3, 1))
    y = local_agg_forward_nhwc(params, x_nhwc)
    return jnp.transpose(y, (0, 3, 1, 2)).astype(jnp.float32)


# ------------------------------------------------------------------- deterministic params

def init_params(key, channels):
    C = channels
    ks = jax.random.split(key, 11)

    def bn(k0, k1, k2, k3):
        gamma = 1.0 + 0.1 * jax.random.normal(k0, (C,), jnp.float32)
        beta = 0.1 * jax.random.normal(k1, (C,), jnp.float32)
        mean = 0.1 * jax.random.normal(k2, (C,), jnp.float32)
        var = 1.0 + jnp.abs(jax.random.normal(k3, (C,), jnp.float32))
        s = gamma / jnp.sqrt(var + _BN_EPS)
        return s, beta - mean * s

    s0, t0 = bn(ks[0], ks[1], ks[2], ks[3])
    s1, t1 = bn(ks[4], ks[5], ks[6], ks[7])

    # 1x1 convs (bias=False), stored in GEMM layout (Cin, Cout).
    w0g = jax.random.normal(ks[8], (C, C), jnp.float32) / jnp.sqrt(C)
    w1g = jax.random.normal(ks[9], (C, C), jnp.float32) / jnp.sqrt(C)
    # depthwise 3x3 weights as (9, C), tap order t = 3*u + v.
    wd = jax.random.normal(ks[10], (9, C), jnp.float32) / 3.0

    # Fold BN0 into pw-conv0 and BN1 into pw-conv1 (inference semantics).
    w0 = (w0g * s0[:, None]).astype(jnp.bfloat16)
    b0 = (t0 @ w0g).reshape(1, C)
    w1 = (w1g * s1[:, None]).astype(jnp.bfloat16)
    b1 = (t1 @ w1g).reshape(1, C)
    return {"w0": w0, "b0": b0, "wd": wd, "w1": w1, "b1": b1}


# --------------------------------------------------------------------- pure-XLA reference

def local_agg_reference(params, x_nchw):
    """Reference with the same bf16 GEMM inputs / bf16 intermediates as the kernel."""
    N, C, H, W = x_nchw.shape
    x = jnp.transpose(x_nchw, (0, 2, 3, 1)).astype(jnp.bfloat16).astype(jnp.float32)
    w0 = params["w0"].astype(jnp.float32)
    w1 = params["w1"].astype(jnp.float32)
    h0 = jnp.einsum("nhwc,cd->nhwd", x, w0) + params["b0"][0]
    h0 = h0.astype(jnp.bfloat16).astype(jnp.float32)          # matches the bf16 halo scratch
    h0p = jnp.pad(h0, ((0, 0), (1, 1), (1, 1), (0, 0)))
    acc = jnp.zeros_like(h0)
    for t in range(9):
        u, v = t // 3, t % 3
        acc = acc + h0p[:, u:u + H, v:v + W, :] * params["wd"][t]
    h1 = acc.astype(jnp.bfloat16).astype(jnp.float32)
    y = jnp.einsum("nhwc,cd->nhwd", h1, w1) + params["b1"][0]
    return jnp.transpose(y, (0, 3, 1, 2))


# ------------------------------------------------------------------------------------ main

if __name__ == "__main__":
    key = jax.random.PRNGKey(0)
    kp, kx = jax.random.split(key)

    # channels=128 keeps the lane dimension dense; batch=4 gives each v7x TensorCore two
    # pipelined grid steps (the N=2 configuration exposes the input/output DMA on v7x).
    N, C, H, W = 4, 128, 16, 16
    params = init_params(kp, C)
    x = jax.random.normal(kx, (N, C, H, W), jnp.float32)

    fwd = jax.jit(lambda a: local_agg_forward(params, a))
    out = jax.block_until_ready(fwd(x))

    assert out.shape == (N, C, H, W)
    assert bool(jnp.all(jnp.isfinite(out)))

    ref = local_agg_reference(params, x)
    # bf16 output quantization bounds |out - ref| by ~|ref| * 2^-8 plus tiny accumulation
    # differences, so use a mixed absolute/relative tolerance.
    err = float(jnp.max(jnp.abs(out - ref) - 1e-2 * jnp.abs(ref)))
    assert err < 5e-3, f"error vs reference: {err}"
    print("KERNEL_OK")
</pallas_src>

<mosaic_0001>
module attributes {stable_mosaic.version = 11 : i64} {
  func.func @_local_agg_kernel(%arg0: i32, %arg1: memref<1x256x128xbf16, #tpu.memory_space<vmem>>, %arg2: memref<128x128xbf16, #tpu.memory_space<vmem>>, %arg3: memref<1x128xf32, #tpu.memory_space<vmem>>, %arg4: memref<9x128xf32, #tpu.memory_space<vmem>>, %arg5: memref<128x128xbf16, #tpu.memory_space<vmem>>, %arg6: memref<1x128xf32, #tpu.memory_space<vmem>>, %arg7: memref<1x4x64x128xbf16, #tpu.memory_space<vmem>>, %arg8: memref<18x16x128xbf16, #tpu.memory_space<vmem>>) attributes {dimension_semantics = [#tpu.dimension_semantics<parallel>], iteration_bounds = array<i64: 4>, scalar_prefetch = 0 : i64, scratch_operands = 1 : i64, tpu.core_type = #tpu.core_type<tc>, window_params = [{transform_indices = @transform_0, window_bounds = array<i64: 1, 256, 128>}, {pipeline_mode = #tpu.pipeline_mode<synchronous>, transform_indices = @transform_1, window_bounds = array<i64: 128, 128>}, {pipeline_mode = #tpu.pipeline_mode<synchronous>, transform_indices = @transform_2, window_bounds = array<i64: 1, 128>}, {pipeline_mode = #tpu.pipeline_mode<synchronous>, transform_indices = @transform_3, window_bounds = array<i64: 9, 128>}, {pipeline_mode = #tpu.pipeline_mode<synchronous>, transform_indices = @transform_4, window_bounds = array<i64: 128, 128>}, {pipeline_mode = #tpu.pipeline_mode<synchronous>, transform_indices = @transform_5, window_bounds = array<i64: 1, 128>}, {transform_indices = @transform_6, window_bounds = array<i64: 1, 4, 64, 128>}]} {
    %c0 = arith.constant 0 : index
    %c0_0 = arith.constant 0 : index
    %c0_1 = arith.constant 0 : index
    %0 = vector.load %arg1[%c0, %c0_0, %c0_1] : memref<1x256x128xbf16, #tpu.memory_space<vmem>>, vector<1x256x128xbf16>
    %1 = vector.shape_cast %0 : vector<1x256x128xbf16> to vector<256x128xbf16>
    %c0_2 = arith.constant 0 : index
    %c0_3 = arith.constant 0 : index
    %2 = vector.load %arg2[%c0_2, %c0_3] : memref<128x128xbf16, #tpu.memory_space<vmem>>, vector<128x128xbf16>
    %cst = arith.constant dense<0.000000e+00> : vector<256x128xf32>
    %3 = tpu.matmul %1, %2, %cst {dimension_numbers = #tpu.dot_dimension_numbers<[1], [0], [0], [1], [0, 0, 1, 1], [], []>} : vector<256x128xbf16>, vector<128x128xbf16>, vector<256x128xf32> -> vector<256x128xf32>
    %c0_4 = arith.constant 0 : index
    %c0_5 = arith.constant 0 : index
    %4 = vector.load %arg3[%c0_4, %c0_5] : memref<1x128xf32, #tpu.memory_space<vmem>>, vector<1x128xf32>
    %5 = vector.broadcast %4 : vector<1x128xf32> to vector<256x128xf32>
    %6 = arith.addf %3, %5 : vector<256x128xf32>
    %cst_6 = arith.constant 0.000000e+00 : bf16
    %7 = vector.broadcast %cst_6 : bf16 to vector<1x16x128xbf16>
    %c0_7 = arith.constant 0 : index
    %c0_8 = arith.constant 0 : index
    %c0_9 = arith.constant 0 : index
    %8 = vector.load %arg8[%c0_7, %c0_8, %c0_9] : memref<18x16x128xbf16, #tpu.memory_space<vmem>>, vector<1x16x128xbf16>
    tpu.vector_store %arg8[%c0_7, %c0_8, %c0_9], %7 {strides = array<i32>} : memref<18x16x128xbf16, #tpu.memory_space<vmem>>, vector<1x16x128xbf16>,
    %c17 = arith.constant 17 : index
    %c0_10 = arith.constant 0 : index
    %c0_11 = arith.constant 0 : index
    %9 = vector.load %arg8[%c17, %c0_10, %c0_11] : memref<18x16x128xbf16, #tpu.memory_space<vmem>>, vector<1x16x128xbf16>
    tpu.vector_store %arg8[%c17, %c0_10, %c0_11], %7 {strides = array<i32>} : memref<18x16x128xbf16, #tpu.memory_space<vmem>>, vector<1x16x128xbf16>,
    %10 = vector.shape_cast %6 : vector<256x128xf32> to vector<16x16x128xf32>
    %11 = arith.truncf %10 : vector<16x16x128xf32> to vector<16x16x128xbf16>
    %c1 = arith.constant 1 : index
    %c0_12 = arith.constant 0 : index
    %c0_13 = arith.constant 0 : index
    %12 = vector.load %arg8[%c1, %c0_12, %c0_13] : memref<18x16x128xbf16, #tpu.memory_space<vmem>>, vector<16x16x128xbf16>
    tpu.vector_store %arg8[%c1, %c0_12, %c0_13], %11 {strides = array<i32>} : memref<18x16x128xbf16, #tpu.memory_space<vmem>>, vector<16x16x128xbf16>,
    %13 = tpu.iota {dimensions = array<i32: 0>} : vector<64x1xi32>
    %c16_i32 = arith.constant 16 : i32
    %c0_i32 = arith.constant 0 : i32
    %14 = arith.cmpi eq, %c16_i32, %c0_i32 : i32
    %c1_i32 = arith.constant 1 : i32
    %15 = arith.select %14, %c1_i32, %c16_i32 : i32
    %16 = vector.broadcast %15 : i32 to vector<64x1xi32>
    %17 = arith.remsi %13, %16 : vector<64x1xi32>
    %c0_i32_14 = arith.constant 0 : i32
    %18 = vector.broadcast %c0_i32_14 : i32 to vector<64x1xi32>
    %19 = arith.cmpi ne, %17, %18 : vector<64x1xi32>
    %c0_i32_15 = arith.constant 0 : i32
    %20 = vector.broadcast %c0_i32_15 : i32 to vector<64x1xi32>
    %21 = arith.cmpi slt, %17, %20 : vector<64x1xi32>
    %c0_i32_16 = arith.constant 0 : i32
    %22 = arith.cmpi slt, %15, %c0_i32_16 : i32
    %23 = vector.broadcast %22 : i1 to vector<64x1xi1>
    %24 = vector.broadcast %23 : vector<64x1xi1> to vector<64x1xi1>
    %25 = arith.xori %21, %24 : vector<64x1xi1>
    %26 = arith.andi %25, %19 : vector<64x1xi1>
    %27 = vector.broadcast %15 : i32 to vector<64x1xi32>
    %28 = arith.addi %17, %27 : vector<64x1xi32>
    %29 = arith.select %26, %28, %17 : vector<64x1xi1>, vector<64x1xi32>
    %c0_i32_17 = arith.constant 0 : i32
    %30 = vector.broadcast %c0_i32_17 : i32 to vector<64x1xi32>
    %31 = arith.cmpi ne, %29, %30 : vector<64x1xi32>
    %c15_i32 = arith.constant 15 : i32
    %32 = vector.broadcast %c15_i32 : i32 to vector<64x1xi32>
    %33 = arith.cmpi ne, %29, %32 : vector<64x1xi32>
    %c0_i32_18 = arith.constant 0 : i32
    %c4_i32 = arith.constant 4 : i32
    %34 = arith.addi %c0_i32_18, %c4_i32 : i32
    %c1_i32_19 = arith.constant 1 : i32
    scf.for %arg9 = %c0_i32_18 to %34 step %c1_i32_19  : i32 {
      %c4_i32_21 = arith.constant 4 : i32
      %35 = arith.muli %arg9, %c4_i32_21 : i32
      %36 = arith.index_cast %35 : i32 to index
      %c0_22 = arith.constant 0 : index
      %c0_23 = arith.constant 0 : index
      %37 = vector.load %arg8[%36, %c0_22, %c0_23] : memref<18x16x128xbf16, #tpu.memory_space<vmem>>, vector<6x16x128xbf16>
      %38 = vector.shape_cast %37 : vector<6x16x128xbf16> to vector<96x128xbf16>
      %cst_24 = arith.constant 0.000000e+00 : f32
      %39 = vector.broadcast %cst_24 : f32 to vector<64x128xf32>
      %40 = vector.extract_strided_slice %38 {offsets = [0, 0], sizes = [64, 128], strides = [1, 1]} : vector<96x128xbf16> to vector<64x128xbf16>
      %41 = arith.extf %40 : vector<64x128xbf16> to vector<64x128xf32>
      %c1_25 = arith.constant 1 : index
      %c0_26 = arith.constant 0 : index
      %42 = vector.load %arg4[%c1_25, %c0_26] : memref<9x128xf32, #tpu.memory_space<vmem>>, vector<1x128xf32>
      %43 = vector.shape_cast %42 : vector<1x128xf32> to vector<128xf32>
      %44 = vector.shape_cast %43 : vector<128xf32> to vector<1x128xf32>
      %45 = vector.broadcast %44 : vector<1x128xf32> to vector<64x128xf32>
      %46 = arith.mulf %41, %45 : vector<64x128xf32>
      %47 = arith.addf %39, %46 : vector<64x128xf32>
      %48 = vector.extract_strided_slice %41 {offsets = [63, 0], sizes = [1, 128], strides = [1, 1]} : vector<64x128xf32> to vector<1x128xf32>
      %49 = vector.extract_strided_slice %41 {offsets = [0, 0], sizes = [63, 128], strides = [1, 1]} : vector<64x128xf32> to vector<63x128xf32>
      %50 = tpu.concatenate %48, %49 in 0 : vector<1x128xf32>, vector<63x128xf32> -> vector<64x128xf32>
      %cst_27 = arith.constant 0.000000e+00 : f32
      %51 = vector.shape_cast %31 : vector<64x1xi1> to vector<64x1xi1>
      %52 = vector.broadcast %51 : vector<64x1xi1> to vector<64x128xi1>
      %53 = vector.broadcast %cst_27 : f32 to vector<64x128xf32>
      %54 = arith.select %52, %50, %53 : vector<64x128xi1>, vector<64x128xf32>
      %c0_28 = arith.constant 0 : index
      %c0_29 = arith.constant 0 : index
      %55 = vector.load %arg4[%c0_28, %c0_29] : memref<9x128xf32, #tpu.memory_space<vmem>>, vector<1x128xf32>
      %56 = vector.shape_cast %55 : vector<1x128xf32> to vector<128xf32>
      %57 = vector.shape_cast %56 : vector<128xf32> to vector<1x128xf32>
      %58 = vector.broadcast %57 : vector<1x128xf32> to vector<64x128xf32>
      %59 = arith.mulf %54, %58 : vector<64x128xf32>
      %60 = arith.addf %47, %59 : vector<64x128xf32>
      %61 = vector.extract_strided_slice %41 {offsets = [1, 0], sizes = [63, 128], strides = [1, 1]} : vector<64x128xf32> to vector<63x128xf32>
      %62 = vector.extract_strided_slice %41 {offsets = [0, 0], sizes = [1, 128], strides = [1, 1]} : vector<64x128xf32> to vector<1x128xf32>
      %63 = tpu.concatenate %61, %62 in 0 : vector<63x128xf32>, vector<1x128xf32> -> vector<64x128xf32>
      %cst_30 = arith.constant 0.000000e+00 : f32
      %64 = vector.shape_cast %33 : vector<64x1xi1> to vector<64x1xi1>
      %65 = vector.broadcast %64 : vector<64x1xi1> to vector<64x128xi1>
      %66 = vector.broadcast %cst_30 : f32 to vector<64x128xf32>
      %67 = arith.select %65, %63, %66 : vector<64x128xi1>, vector<64x128xf32>
      %c2 = arith.constant 2 : index
      %c0_31 = arith.constant 0 : index
      %68 = vector.load %arg4[%c2, %c0_31] : memref<9x128xf32, #tpu.memory_space<vmem>>, vector<1x128xf32>
      %69 = vector.shape_cast %68 : vector<1x128xf32> to vector<128xf32>
      %70 = vector.shape_cast %69 : vector<128xf32> to vector<1x128xf32>
      %71 = vector.broadcast %70 : vector<1x128xf32> to vector<64x128xf32>
      %72 = arith.mulf %67, %71 : vector<64x128xf32>
      %73 = arith.addf %60, %72 : vector<64x128xf32>
      %74 = vector.extract_strided_slice %38 {offsets = [16, 0], sizes = [64, 128], strides = [1, 1]} : vector<96x128xbf16> to vector<64x128xbf16>
      %75 = arith.extf %74 : vector<64x128xbf16> to vector<64x128xf32>
      %c4 = arith.constant 4 : index
      %c0_32 = arith.constant 0 : index
      %76 = vector.load %arg4[%c4, %c0_32] : memref<9x128xf32, #tpu.memory_space<vmem>>, vector<1x128xf32>
      %77 = vector.shape_cast %76 : vector<1x128xf32> to vector<128xf32>
      %78 = vector.shape_cast %77 : vector<128xf32> to vector<1x128xf32>
      %79 = vector.broadcast %78 : vector<1x128xf32> to vector<64x128xf32>
      %80 = arith.mulf %75, %79 : vector<64x128xf32>
      %81 = arith.addf %73, %80 : vector<64x128xf32>
      %82 = vector.extract_strided_slice %75 {offsets = [63, 0], sizes = [1, 128], strides = [1, 1]} : vector<64x128xf32> to vector<1x128xf32>
      %83 = vector.extract_strided_slice %75 {offsets = [0, 0], sizes = [63, 128], strides = [1, 1]} : vector<64x128xf32> to vector<63x128xf32>
      %84 = tpu.concatenate %82, %83 in 0 : vector<1x128xf32>, vector<63x128xf32> -> vector<64x128xf32>
      %cst_33 = arith.constant 0.000000e+00 : f32
      %85 = vector.shape_cast %31 : vector<64x1xi1> to vector<64x1xi1>
      %86 = vector.broadcast %85 : vector<64x1xi1> to vector<64x128xi1>
      %87 = vector.broadcast %cst_33 : f32 to vector<64x128xf32>
      %88 = arith.select %86, %84, %87 : vector<64x128xi1>, vector<64x128xf32>
      %c3 = arith.constant 3 : index
      %c0_34 = arith.constant 0 : index
      %89 = vector.load %arg4[%c3, %c0_34] : memref<9x128xf32, #tpu.memory_space<vmem>>, vector<1x128xf32>
      %90 = vector.shape_cast %89 : vector<1x128xf32> to vector<128xf32>
      %91 = vector.shape_cast %90 : vector<128xf32> to vector<1x128xf32>
      %92 = vector.broadcast %91 : vector<1x128xf32> to vector<64x128xf32>
      %93 = arith.mulf %88, %92 : vector<64x128xf32>
      %94 = arith.addf %81, %93 : vector<64x128xf32>
      %95 = vector.extract_strided_slice %75 {offsets = [1, 0], sizes = [63, 128], strides = [1, 1]} : vector<64x128xf32> to vector<63x128xf32>
      %96 = vector.extract_strided_slice %75 {offsets = [0, 0], sizes = [1, 128], strides = [1, 1]} : vector<64x128xf32> to vector<1x128xf32>
      %97 = tpu.concatenate %95, %96 in 0 : vector<63x128xf32>, vector<1x128xf32> -> vector<64x128xf32>
      %cst_35 = arith.constant 0.000000e+00 : f32
      %98 = vector.shape_cast %33 : vector<64x1xi1> to vector<64x1xi1>
      %99 = vector.broadcast %98 : vector<64x1xi1> to vector<64x128xi1>
      %100 = vector.broadcast %cst_35 : f32 to vector<64x128xf32>
      %101 = arith.select %99, %97, %100 : vector<64x128xi1>, vector<64x128xf32>
      %c5 = arith.constant 5 : index
      %c0_36 = arith.constant 0 : index
      %102 = vector.load %arg4[%c5, %c0_36] : memref<9x128xf32, #tpu.memory_space<vmem>>, vector<1x128xf32>
      %103 = vector.shape_cast %102 : vector<1x128xf32> to vector<128xf32>
      %104 = vector.shape_cast %103 : vector<128xf32> to vector<1x128xf32>
      %105 = vector.broadcast %104 : vector<1x128xf32> to vector<64x128xf32>
      %106 = arith.mulf %101, %105 : vector<64x128xf32>
      %107 = arith.addf %94, %106 : vector<64x128xf32>
      %108 = vector.extract_strided_slice %38 {offsets = [32, 0], sizes = [64, 128], strides = [1, 1]} : vector<96x128xbf16> to vector<64x128xbf16>
      %109 = arith.extf %108 : vector<64x128xbf16> to vector<64x128xf32>
      %c7 = arith.constant 7 : index
      %c0_37 = arith.constant 0 : index
      %110 = vector.load %arg4[%c7, %c0_37] : memref<9x128xf32, #tpu.memory_space<vmem>>, vector<1x128xf32>
      %111 = vector.shape_cast %110 : vector<1x128xf32> to vector<128xf32>
      %112 = vector.shape_cast %111 : vector<128xf32> to vector<1x128xf32>
      %113 = vector.broadcast %112 : vector<1x128xf32> to vector<64x128xf32>
      %114 = arith.mulf %109, %113 : vector<64x128xf32>
      %115 = arith.addf %107, %114 : vector<64x128xf32>
      %116 = vector.extract_strided_slice %109 {offsets = [63, 0], sizes = [1, 128], strides = [1, 1]} : vector<64x128xf32> to vector<1x128xf32>
      %117 = vector.extract_strided_slice %109 {offsets = [0, 0], sizes = [63, 128], strides = [1, 1]} : vector<64x128xf32> to vector<63x128xf32>
      %118 = tpu.concatenate %116, %117 in 0 : vector<1x128xf32>, vector<63x128xf32> -> vector<64x128xf32>
      %cst_38 = arith.constant 0.000000e+00 : f32
      %119 = vector.shape_cast %31 : vector<64x1xi1> to vector<64x1xi1>
      %120 = vector.broadcast %119 : vector<64x1xi1> to vector<64x128xi1>
      %121 = vector.broadcast %cst_38 : f32 to vector<64x128xf32>
      %122 = arith.select %120, %118, %121 : vector<64x128xi1>, vector<64x128xf32>
      %c6 = arith.constant 6 : index
      %c0_39 = arith.constant 0 : index
      %123 = vector.load %arg4[%c6, %c0_39] : memref<9x128xf32, #tpu.memory_space<vmem>>, vector<1x128xf32>
      %124 = vector.shape_cast %123 : vector<1x128xf32> to vector<128xf32>
      %125 = vector.shape_cast %124 : vector<128xf32> to vector<1x128xf32>
      %126 = vector.broadcast %125 : vector<1x128xf32> to vector<64x128xf32>
      %127 = arith.mulf %122, %126 : vector<64x128xf32>
      %128 = arith.addf %115, %127 : vector<64x128xf32>
      %129 = vector.extract_strided_slice %109 {offsets = [1, 0], sizes = [63, 128], strides = [1, 1]} : vector<64x128xf32> to vector<63x128xf32>
      %130 = vector.extract_strided_slice %109 {offsets = [0, 0], sizes = [1, 128], strides = [1, 1]} : vector<64x128xf32> to vector<1x128xf32>
      %131 = tpu.concatenate %129, %130 in 0 : vector<63x128xf32>, vector<1x128xf32> -> vector<64x128xf32>
      %cst_40 = arith.constant 0.000000e+00 : f32
      %132 = vector.shape_cast %33 : vector<64x1xi1> to vector<64x1xi1>
      %133 = vector.broadcast %132 : vector<64x1xi1> to vector<64x128xi1>
      %134 = vector.broadcast %cst_40 : f32 to vector<64x128xf32>
      %135 = arith.select %133, %131, %134 : vector<64x128xi1>, vector<64x128xf32>
      %c8 = arith.constant 8 : index
      %c0_41 = arith.constant 0 : index
      %136 = vector.load %arg4[%c8, %c0_41] : memref<9x128xf32, #tpu.memory_space<vmem>>, vector<1x128xf32>
      %137 = vector.shape_cast %136 : vector<1x128xf32> to vector<128xf32>
      %138 = vector.shape_cast %137 : vector<128xf32> to vector<1x128xf32>
      %139 = vector.broadcast %138 : vector<1x128xf32> to vector<64x128xf32>
      %140 = arith.mulf %135, %139 : vector<64x128xf32>
      %141 = arith.addf %128, %140 : vector<64x128xf32>
      %142 = arith.truncf %141 : vector<64x128xf32> to vector<64x128xbf16>
      %c0_42 = arith.constant 0 : index
      %c0_43 = arith.constant 0 : index
      %143 = vector.load %arg5[%c0_42, %c0_43] : memref<128x128xbf16, #tpu.memory_space<vmem>>, vector<128x128xbf16>
      %cst_44 = arith.constant dense<0.000000e+00> : vector<64x128xf32>
      %144 = tpu.matmul %142, %143, %cst_44 {dimension_numbers = #tpu.dot_dimension_numbers<[1], [0], [0], [1], [0, 0, 1, 1], [], []>} : vector<64x128xbf16>, vector<128x128xbf16>, vector<64x128xf32> -> vector<64x128xf32>
      %c0_45 = arith.constant 0 : index
      %c0_46 = arith.constant 0 : index
      %145 = vector.load %arg6[%c0_45, %c0_46] : memref<1x128xf32, #tpu.memory_space<vmem>>, vector<1x128xf32>
      %146 = vector.broadcast %145 : vector<1x128xf32> to vector<64x128xf32>
      %147 = arith.addf %144, %146 : vector<64x128xf32>
      %148 = arith.truncf %147 : vector<64x128xf32> to vector<64x128xbf16>
      %149 = vector.shape_cast %148 : vector<64x128xbf16> to vector<1x64x128xbf16>
      %c0_47 = arith.constant 0 : index
      %150 = arith.index_cast %arg9 : i32 to index
      %c0_48 = arith.constant 0 : index
      %c0_49 = arith.constant 0 : index
      %151 = vector.load %arg7[%c0_47, %150, %c0_48, %c0_49] : memref<1x4x64x128xbf16, #tpu.memory_space<vmem>>, vector<1x1x64x128xbf16>
      %152 = vector.shape_cast %151 : vector<1x1x64x128xbf16> to vector<1x64x128xbf16>
      %153 = vector.shape_cast %149 : vector<1x64x128xbf16> to vector<1x1x64x128xbf16>
      tpu.vector_store %arg7[%c0_47, %150, %c0_48, %c0_49], %153 {strides = array<i32>} : memref<1x4x64x128xbf16, #tpu.memory_space<vmem>>, vector<1x1x64x128xbf16>,
    }
    %c4_i32_20 = arith.constant 4 : i32
    return
  }
  func.func @transform_0(%arg0: i32) -> (i32, i32, i32) {
    %c0_i32 = arith.constant 0 : i32
    %c0_i32_0 = arith.constant 0 : i32
    %c0_i32_1 = arith.constant 0 : i32
    return %arg0, %c0_i32, %c0_i32_0 : i32, i32, i32
  }
  func.func @transform_1(%arg0: i32) -> (i32, i32) {
    %c0_i32 = arith.constant 0 : i32
    %c0_i32_0 = arith.constant 0 : i32
    %c0_i32_1 = arith.constant 0 : i32
    return %c0_i32, %c0_i32_0 : i32, i32
  }
  func.func @transform_2(%arg0: i32) -> (i32, i32) {
    %c0_i32 = arith.constant 0 : i32
    %c0_i32_0 = arith.constant 0 : i32
    %c0_i32_1 = arith.constant 0 : i32
    return %c0_i32, %c0_i32_0 : i32, i32
  }
  func.func @transform_3(%arg0: i32) -> (i32, i32) {
    %c0_i32 = arith.constant 0 : i32
    %c0_i32_0 = arith.constant 0 : i32
    %c0_i32_1 = arith.constant 0 : i32
    return %c0_i32, %c0_i32_0 : i32, i32
  }
  func.func @transform_4(%arg0: i32) -> (i32, i32) {
    %c0_i32 = arith.constant 0 : i32
    %c0_i32_0 = arith.constant 0 : i32
    %c0_i32_1 = arith.constant 0 : i32
    return %c0_i32, %c0_i32_0 : i32, i32
  }
  func.func @transform_5(%arg0: i32) -> (i32, i32) {
    %c0_i32 = arith.constant 0 : i32
    %c0_i32_0 = arith.constant 0 : i32
    %c0_i32_1 = arith.constant 0 : i32
    return %c0_i32, %c0_i32_0 : i32, i32
  }
  func.func @transform_6(%arg0: i32) -> (i32, i32, i32, i32) {
    %c0_i32 = arith.constant 0 : i32
    %c0_i32_0 = arith.constant 0 : i32
    %c0_i32_1 = arith.constant 0 : i32
    %c0_i32_2 = arith.constant 0 : i32
    return %arg0, %c0_i32, %c0_i32_0, %c0_i32_1 : i32, i32, i32, i32
  }
}

</mosaic_0001>

<bundles_post_ra>
// kernel: _lambda_.1
= control target key start
LH: loop header
LB: loop body
LE: loop exit
PB: predicated region body
PF: predicated region fallthrough
CT: control target
= control target key end

     0   :  { %s1755_s21 = smov 0   ;;  %s2295_s0 = inlined_call_operand.vmem [shape: bf16[4,256,128], index: 0, kind: input, shape index: {}]   ;;  %s2296_s1 = inlined_call_operand.vmem [shape: bf16[128,128], index: 1, kind: input, shape index: {}]   ;;  %s2297_s2 = inlined_call_operand.vmem [shape: f32[1,128], index: 2, kind: input, shape index: {}]   ;;  %s2298_s3 = inlined_call_operand.vmem [shape: f32[9,128], index: 3, kind: input, shape index: {}]   ;;  %s2299_s4 = inlined_call_operand.vmem [shape: bf16[128,128], index: 4, kind: input, shape index: {}]   ;;  %s2300_s5 = inlined_call_operand.vmem [shape: f32[1,128], index: 5, kind: input, shape index: {}]   ;;  %s2301_s6 = inlined_call_operand.vmem [shape: bf16[4,4,64,128], index: 6, kind: output, shape index: {}]  }
   0x1 LB: > { %s1413_s22 = sadd.s32 4294967295, %s1713_s21   ;;  %p1417_p0 = scmp.ge.s32.totalorder %s1713_s21, 1  ;;  %s1713_s21 = sphi %s1755_s21, %s16_s21  }
   0x2   : > { %p212_p1 = scmp.lt.s32.totalorder %s1713_s21, 5 }
   0x4   : > { %p213_p2 = pnand %p1417_p0, %p212_p1 }
   0x5   : > { %v1671_v0 = vld [vmem:[%s2296_s1] sm:$0xff] (!%p213_p2)   ;;  %p242_p3 = scmp.lt.s32.totalorder (!%p213_p2), %s1413_s22, 3  ;;  %v1672_v1 = vld [vmem:[%s2296_s1 + $0x8] sm:$0xff] (!%p213_p2)   ;;  %v1673_v2 = vld [vmem:[%s2296_s1 + $0x10] sm:$0xff] (!%p213_p2)   ;;  %v649_v24 = vlaneseq (!%p213_p2)  ;;  %v1719_v40 = vmov (!%p213_p2), 0   ;;  %s1882_s25 = smov (!%p213_p2), 0  }
   0x6   : > { %216 = sbr.rel (%p213_p2) target bundleno = 572 (0x23c), region = 44  ;;  %1550 = vmatprep.subr.bf16.mxu0 (!%p213_p2), %v1671_v0  ;;  %1622 = vmatprep.subr.bf16.mxu1 (!%p213_p2), %v1671_v0  ;;  %v1674_v3 = vld [vmem:[%s2296_s1 + $0x18] sm:$0xff] (!%p213_p2)   ;;  %v1675_v6 = vld [vmem:[%s2296_s1 + $0x20] sm:$0xff] (!%p213_p2)   ;;  %v1676_v7 = vld [vmem:[%s2296_s1 + $0x28] sm:$0xff] (!%p213_p2)   ;;  %613 = vst [vmem:[#allocation2] sm:$0xff] (!%p213_p2), %v1719_v40 }
   0x7   : > { %1551 = vmatpush3.bf16.msra.mxu0 (!%p213_p2), %v1671_v0  ;;  %1630 = vmatpush3.bf16.msra.mxu1 (!%p213_p2), %v1671_v0  ;;  %v1677_v8 = vld [vmem:[%s2296_s1 + $0x30] sm:$0xff] (!%p213_p2)   ;;  %v1678_v9 = vld [vmem:[%s2296_s1 + $0x38] sm:$0xff] (!%p213_p2)   ;;  %v650_v25 = vshrl.u32 (!%p213_p2), %v649_v24, 7  ;;  %615 = vst [vmem:[#allocation2 + $0x88] sm:$0xff] (!%p213_p2), %v1719_v40  ;;  %v1848_v51 = vld [vmem:[%s2297_s2] ss:$0 sm:$0xff] (!%p213_p2) }
   0x8   : > { %1552 = vmatprep.subr.bf16.mxu0 (!%p213_p2), %v1672_v1  ;;  %1623 = vmatprep.subr.bf16.mxu1 (!%p213_p2), %v1672_v1 }
   0x9   : > { %v651_v26 = vadd.s32 (!%p213_p2), 8, %v650_v25  ;;  %v652_v27 = vadd.s32 (!%p213_p2), 16, %v650_v25  ;;  %v653_v28 = vadd.s32 (!%p213_p2), 24, %v650_v25  ;;  %v654_v29 = vadd.s32 (!%p213_p2), 32, %v650_v25 }
   0xa   : > { %v655_v30 = vadd.s32 (!%p213_p2), 40, %v650_v25  ;;  %v656_v31 = vadd.s32 (!%p213_p2), 48, %v650_v25  ;;  %v657_v32 = vadd.s32 (!%p213_p2), 56, %v650_v25  ;;  %v662_v33 = vand.u32 (!%p213_p2), 15, %v650_v25 }
   0xb   : > { %1553 = vmatpush3.bf16.msra.mxu0 (!%p213_p2), %v1672_v1  ;;  %1631 = vmatpush3.bf16.msra.mxu1 (!%p213_p2), %v1672_v1  ;;  %v669_v34 = vand.u32 (!%p213_p2), 15, %v651_v26  ;;  %v676_v35 = vand.u32 (!%p213_p2), 15, %v652_v27  ;;  %v683_v36 = vand.u32 (!%p213_p2), 15, %v653_v28  ;;  %v690_v37 = vand.u32 (!%p213_p2), 15, %v654_v29 }
   0xc   : > { %1554 = vmatprep.subr.bf16.mxu0 (!%p213_p2), %v1673_v2  ;;  %1624 = vmatprep.subr.bf16.mxu1 (!%p213_p2), %v1673_v2  ;;  %v697_v38 = vand.u32 (!%p213_p2), 15, %v655_v30  ;;  %v704_v39 = vand.u32 (!%p213_p2), 15, %v656_v31  ;;  %v711_v41 = vand.u32 (!%p213_p2), 15, %v657_v32  ;;  %vm1813_vm0 = vcmp.ne.s32.totalorder (!%p213_p2), %v662_v33, 0 }
   0xd   : > { %s2319_s22 = smov (!%p242_p3, %s1413_s22), 3  ;;  %vm1817_vm1 = vcmp.ne.s32.totalorder %v676_v35, 0  ;;  %vm1821_vm2 = vcmp.ne.s32.totalorder %v669_v34, 15  ;;  %vm1825_vm3 = vcmp.ne.s32.totalorder %v690_v37, 0  ;;  %vm1833_vm5 = vcmp.ne.s32.totalorder %v683_v36, 15 }
   0xe   : > { %s1479_s29 = sshll.u32 %s2319_s22, 7  ;;  %vm1829_vm4 = vcmp.ne.s32.totalorder %v704_v39, 0  ;;  %vm1837_vm6 = vcmp.ne.s32.totalorder %v697_v38, 15  ;;  %vm1841_vm7 = vcmp.ne.s32.totalorder %v711_v41, 15 }
   0xf   : > { %s1775_s8 = scalar_lea.vmem %s2295_s0, %s1479_s29  ;;  %s1780_s11 = scalar_lea.vmem %s2301_s6, %s1479_s29  ;;  %1555 = vmatpush3.bf16.msra.mxu0 %v1673_v2  ;;  %1632 = vmatpush3.bf16.msra.mxu1 %v1673_v2 }
  0x10   : > { %v1679_v4 = vld [vmem:[%s1775_s8] sm:$0xff]   ;;  %1556 = vmatprep.subr.bf16.mxu0 %v1674_v3  ;;  %1625 = vmatprep.subr.bf16.mxu1 %v1674_v3  ;;  %v1681_v10 = vld [vmem:[%s1775_s8 + $0x8] sm:$0xff]   ;;  %v1683_v12 = vld [vmem:[%s1775_s8 + $0x10] sm:$0xff]  }
  0x11   : > { %v1680_v5 = vld [vmem:[%s1775_s8 + $0x40] sm:$0xff]   ;;  %1566 = vmatprep.mubr.bf16.mxu0 %v1679_v4  ;;  %v1682_v11 = vld [vmem:[%s1775_s8 + $0x48] sm:$0xff]   ;;  %v1684_v13 = vld [vmem:[%s1775_s8 + $0x50] sm:$0xff]  }
  0x12   : > { %1582 = vmatprep.mubr.bf16.mxu1 %v1680_v5  ;;  %v1685_v14 = vld [vmem:[%s1775_s8 + $0x18] sm:$0xff]   ;;  %v1687_v16 = vld [vmem:[%s1775_s8 + $0x20] sm:$0xff]   ;;  %v1689_v18 = vld [vmem:[%s1775_s8 + $0x28] sm:$0xff]  }
  0x13   : > { %1557 = vmatpush3.bf16.msra.mxu0 %v1674_v3  ;;  %1633 = vmatpush3.bf16.msra.mxu1 %v1674_v3  ;;  %v1686_v15 = vld [vmem:[%s1775_s8 + $0x58] sm:$0xff]   ;;  %v1688_v17 = vld [vmem:[%s1775_s8 + $0x60] sm:$0xff]   ;;  %v1690_v19 = vld [vmem:[%s1775_s8 + $0x68] sm:$0xff]  }
  0x14   : > { %1558 = vmatprep.subr.bf16.mxu0 %v1675_v6  ;;  %1626 = vmatprep.subr.bf16.mxu1 %v1675_v6  ;;  %v1691_v20 = vld [vmem:[%s1775_s8 + $0x30] sm:$0xff]   ;;  %v1693_v22 = vld [vmem:[%s1775_s8 + $0x38] sm:$0xff]  }
  0x15   : > { %v1692_v21 = vld [vmem:[%s1775_s8 + $0x70] sm:$0xff]   ;;  %v1694_v23 = vld [vmem:[%s1775_s8 + $0x78] sm:$0xff]  }
  0x17   : > { %1559 = vmatpush3.bf16.msra.mxu0 %v1675_v6  ;;  %1634 = vmatpush3.bf16.msra.mxu1 %v1675_v6 }
  0x18   : > { %1560 = vmatprep.subr.bf16.mxu0 %v1676_v7  ;;  %1627 = vmatprep.subr.bf16.mxu1 %v1676_v7 }
  0x1b   : > { %1561 = vmatpush3.bf16.msra.mxu0 %v1676_v7  ;;  %1635 = vmatpush3.bf16.msra.mxu1 %v1676_v7 }
  0x1c   : > { %1562 = vmatprep.subr.bf16.mxu0 %v1677_v8  ;;  %1628 = vmatprep.subr.bf16.mxu1 %v1677_v8 }
  0x1f   : > { %1563 = vmatpush3.bf16.msra.mxu0 %v1677_v8  ;;  %1636 = vmatpush3.bf16.msra.mxu1 %v1677_v8 }
  0x20   : > { %1564 = vmatprep.subr.bf16.mxu0 %v1678_v9  ;;  %1629 = vmatprep.subr.bf16.mxu1 %v1678_v9 }
  0x23   : > { %1565 = vmatpush3.bf16.msra.mxu0 %v1678_v9  ;;  %1637 = vmatpush3.bf16.msra.mxu1 %v1678_v9 }
  0x26   : > { %1567 = vmatmul.mubr.bf16.vlgmr.msra.gmra.mrb[0].mxu0 %v1681_v10  ;;  %1583 = vmatmul.mubr.bf16.vlgmr.msra.gmra.mrb[0].mxu1 %v1682_v11 }
  0x27   : > { %1570 = vmatprep.mubr.bf16.mxu0 %v1683_v12  ;;  %1586 = vmatprep.mubr.bf16.mxu1 %v1684_v13 }
  0x2e   : > { %1571 = vmatmul.mubr.bf16.gmra.mrb[4].mxu0 %v1685_v14  ;;  %1587 = vmatmul.mubr.bf16.gmra.mrb[4].mxu1 %v1686_v15 }
  0x2f   : > { %1574 = vmatprep.mubr.bf16.mxu0 %v1687_v16  ;;  %1590 = vmatprep.mubr.bf16.mxu1 %v1688_v17 }
  0x36   : > { %1575 = vmatmul.mubr.bf16.gmra.mrb[8].mxu0 %v1689_v18  ;;  %1591 = vmatmul.mubr.bf16.gmra.mrb[8].mxu1 %v1690_v19 }
  0x37   : > { %1578 = vmatprep.mubr.bf16.mxu0 %v1691_v20  ;;  %1594 = vmatprep.mubr.bf16.mxu1 %v1692_v21 }
  0x3e   : > { %1579 = vmatmul.mubr.bf16.gmra.mrb[12].mxu0 %v1693_v22  ;;  %1595 = vmatmul.mubr.bf16.gmra.mrb[12].mxu1 %v1694_v23 }
  0xf9   : > { %v1568_v50 = vpop.f32.mrb[0].mxu0  ;;  %v1584_v52 = vpop.f32.mrb[0].mxu1 }
  0xfa   : > { %v486_v53 = vpop.f32.mrb[1].mxu0  ;;  %v550_v54 = vpop.f32.mrb[1].mxu1  ;;  %v495_v57 = vadd.f32 %v1568_v50, %v1848_v51  ;;  %v559_v58 = vadd.f32 %v1584_v52, %v1848_v51 }
  0xfb   : > { %v1569_v55 = vpop.f32.mrb[2].mxu0  ;;  %v1585_v56 = vpop.f32.mrb[2].mxu1  ;;  %v487_v63 = vadd.f32 %v1848_v51, %v486_v53  ;;  %v551_v0 = vadd.f32 %v1848_v51, %v550_v54 }
  0xfc   : > { %v498_v59 = vadd.f32 %v1569_v55, %v1848_v51  ;;  %v562_v60 = vadd.f32 %v1585_v56, %v1848_v51  ;;  %v489_v61 = vpop.f32.mrb[3].mxu0  ;;  %v553_v62 = vpop.f32.mrb[3].mxu1 }
  0xfd   : > { %v490_v1 = vadd.f32 %v1848_v51, %v489_v61  ;;  %v554_v2 = vadd.f32 %v1848_v51, %v553_v62 }
  0xfe   : > { %v617_v3 = vpack.c.bf16 %v498_v59, %v495_v57  ;;  %v625_v4 = vpack.c.bf16 %v562_v60, %v559_v58 }
  0xff   : > { %v616_v5 = vpack.c.bf16 %v490_v1, %v487_v63  ;;  %v624_v6 = vpack.c.bf16 %v554_v2, %v551_v0 }
 0x100   : > { %634 = vst [vmem:[#allocation2 + $0x10] sm:$0xff] %v617_v3  ;;  %642 = vst [vmem:[#allocation2 + $0x50] sm:$0xff] %v625_v4 }
 0x101   : > { %633 = vst [vmem:[#allocation2 + $0x8] sm:$0xff] %v616_v5  ;;  %641 = vst [vmem:[#allocation2 + $0x48] sm:$0xff] %v624_v6  ;;  %v1572_v7 = vpop.f32.mrb[4].mxu0  ;;  %v1588_v8 = vpop.f32.mrb[4].mxu1 }
 0x102   : > { %v502_v9 = vpop.f32.mrb[5].mxu0  ;;  %v566_v10 = vpop.f32.mrb[5].mxu1  ;;  %v511_v13 = vadd.f32 %v1572_v7, %v1848_v51  ;;  %v575_v14 = vadd.f32 %v1588_v8, %v1848_v51 }
 0x103   : > { %v1573_v11 = vpop.f32.mrb[6].mxu0  ;;  %v1589_v12 = vpop.f32.mrb[6].mxu1  ;;  %v503_v19 = vadd.f32 %v1848_v51, %v502_v9  ;;  %v567_v20 = vadd.f32 %v1848_v51, %v566_v10 }
 0x104   : > { %v514_v15 = vadd.f32 %v1573_v11, %v1848_v51  ;;  %v578_v16 = vadd.f32 %v1589_v12, %v1848_v51  ;;  %v505_v17 = vpop.f32.mrb[7].mxu0  ;;  %v569_v18 = vpop.f32.mrb[7].mxu1 }
 0x105   : > { %v506_v21 = vadd.f32 %v1848_v51, %v505_v17  ;;  %v570_v22 = vadd.f32 %v1848_v51, %v569_v18 }
 0x106   : > { %v619_v23 = vpack.c.bf16 %v514_v15, %v511_v13  ;;  %v627_v24 = vpack.c.bf16 %v578_v16, %v575_v14 }
 0x107   : > { %v618_v25 = vpack.c.bf16 %v506_v21, %v503_v19  ;;  %v626_v26 = vpack.c.bf16 %v570_v22, %v567_v20 }
 0x108   : > { %636 = vst [vmem:[#allocation2 + $0x20] sm:$0xff] %v619_v23  ;;  %644 = vst [vmem:[#allocation2 + $0x60] sm:$0xff] %v627_v24 }
 0x109   : > { %635 = vst [vmem:[#allocation2 + $0x18] sm:$0xff] %v618_v25  ;;  %643 = vst [vmem:[#allocation2 + $0x58] sm:$0xff] %v626_v26  ;;  %v1576_v27 = vpop.f32.mrb[8].mxu0  ;;  %v1592_v28 = vpop.f32.mrb[8].mxu1 }
 0x10a   : > { %v518_v29 = vpop.f32.mrb[9].mxu0  ;;  %v582_v30 = vpop.f32.mrb[9].mxu1  ;;  %v527_v33 = vadd.f32 %v1576_v27, %v1848_v51  ;;  %v591_v34 = vadd.f32 %v1592_v28, %v1848_v51 }
 0x10b   : > { %v1577_v31 = vpop.f32.mrb[10].mxu0  ;;  %v1593_v32 = vpop.f32.mrb[10].mxu1  ;;  %v519_v39 = vadd.f32 %v1848_v51, %v518_v29  ;;  %v583_v40 = vadd.f32 %v1848_v51, %v582_v30 }
 0x10c   : > { %v530_v35 = vadd.f32 %v1577_v31, %v1848_v51  ;;  %v594_v36 = vadd.f32 %v1593_v32, %v1848_v51  ;;  %v521_v37 = vpop.f32.mrb[11].mxu0  ;;  %v585_v38 = vpop.f32.mrb[11].mxu1 }
 0x10d   : > { %v522_v41 = vadd.f32 %v1848_v51, %v521_v37  ;;  %v586_v50 = vadd.f32 %v1848_v51, %v585_v38 }
 0x10e   : > { %v621_v52 = vpack.c.bf16 %v530_v35, %v527_v33  ;;  %v629_v53 = vpack.c.bf16 %v594_v36, %v591_v34 }
 0x10f   : > { %v620_v54 = vpack.c.bf16 %v522_v41, %v519_v39  ;;  %v628_v55 = vpack.c.bf16 %v586_v50, %v583_v40 }
 0x110   : > { %638 = vst [vmem:[#allocation2 + $0x30] sm:$0xff] %v621_v52  ;;  %646 = vst [vmem:[#allocation2 + $0x70] sm:$0xff] %v629_v53 }
 0x111   : > { %637 = vst [vmem:[#allocation2 + $0x28] sm:$0xff] %v620_v54  ;;  %645 = vst [vmem:[#allocation2 + $0x68] sm:$0xff] %v628_v55  ;;  %v1580_v56 = vpop.f32.mrb[12].mxu0  ;;  %v1596_v57 = vpop.f32.mrb[12].mxu1 }
 0x112   : > { %v534_v58 = vpop.f32.mrb[13].mxu0  ;;  %v598_v59 = vpop.f32.mrb[13].mxu1  ;;  %v543_v62 = vadd.f32 %v1580_v56, %v1848_v51  ;;  %v607_v63 = vadd.f32 %v1596_v57, %v1848_v51 }
 0x113   : > { %v1581_v60 = vpop.f32.mrb[14].mxu0  ;;  %v1597_v61 = vpop.f32.mrb[14].mxu1  ;;  %v535_v4 = vadd.f32 %v1848_v51, %v534_v58  ;;  %v599_v5 = vadd.f32 %v1848_v51, %v598_v59 }
 0x114   : > { %v546_v0 = vadd.f32 %v1581_v60, %v1848_v51  ;;  %v610_v1 = vadd.f32 %v1597_v61, %v1848_v51  ;;  %v537_v2 = vpop.f32.mrb[15].mxu0  ;;  %v601_v3 = vpop.f32.mrb[15].mxu1 }
 0x115   : > { %v538_v6 = vadd.f32 %v1848_v51, %v537_v2  ;;  %v602_v7 = vadd.f32 %v1848_v51, %v601_v3 }
 0x116   : > { %v623_v8 = vpack.c.bf16 %v546_v0, %v543_v62  ;;  %v631_v9 = vpack.c.bf16 %v610_v1, %v607_v63 }
 0x117   : > { %v622_v10 = vpack.c.bf16 %v538_v6, %v535_v4  ;;  %v630_v11 = vpack.c.bf16 %v602_v7, %v599_v5 }
 0x118   : > { %640 = vst [vmem:[#allocation2 + $0x40] sm:$0xff] %v623_v8  ;;  %648 = vst [vmem:[#allocation2 + $0x80] sm:$0xff] %v631_v9 }
 0x119   : > { %639 = vst [vmem:[#allocation2 + $0x38] sm:$0xff] %v622_v10  ;;  %647 = vst [vmem:[#allocation2 + $0x78] sm:$0xff] %v630_v11 }
 0x11a LB: >> { %v1695_v51 = vld [vmem:[%s2299_s4] sm:$0xff]   ;;  %v1696_v12 = vld [vmem:[%s2299_s4 + $0x8] sm:$0xff]   ;;  %s1481_s30 = sshll.u32 %s1717_s25, 5  ;;  %v1697_v13 = vld [vmem:[%s2299_s4 + $0x10] sm:$0xff]   ;;  %vm824_vm8 = vcmask 1040384   ;;  %vm893_vm9 = vcmask 1046528   ;;  %s1717_s25 = sphi %s1882_s25, %s775_s25  }
 0x11b   : >> { %1598 = vmatprep.subr.bf16.mxu0 %v1695_v51  ;;  %1638 = vmatprep.subr.bf16.mxu1 %v1695_v51  ;;  %v1698_v14 = vld [vmem:[%s2299_s4 + $0x18] sm:$0xff]   ;;  %s1902_s12 = scalar_lea.vmem [#allocation2], %s1481_s30  ;;  %v1927_v27 = vld [vmem:[%s2298_s3 + $0x1] ss:$0 sm:$0xff]  ;;  %v1959_v41 = vld [vmem:[%s2298_s3] ss:$0 sm:$0xff]  ;;  %s1340_s22 = scalar_lea.vmem %s1780_s11, %s1481_s30 }
 0x11c   : >> { %1599 = vmatpush3.bf16.msra.mxu0 %v1695_v51  ;;  %1646 = vmatpush3.bf16.msra.mxu1 %v1695_v51  ;;  %v1699_v32 = vld [vmem:[%s2299_s4 + $0x20] sm:$0xff]   ;;  %v1700_v59 = vld [vmem:[%s2299_s4 + $0x28] sm:$0xff]   ;;  %s775_s25 = sadd.s32 1, %s1717_s25  }
 0x11d   : >> { %1600 = vmatprep.subr.bf16.mxu0 %v1696_v12  ;;  %1639 = vmatprep.subr.bf16.mxu1 %v1696_v12  ;;  %v2007_v8 = vld [vmem:[%s2298_s3 + $0x2] ss:$0 sm:$0xff]  ;;  %p772_p4 = scmp.ge.s32.totalorder %s775_s25, 4  }
 0x120   : >> { %1601 = vmatpush3.bf16.msra.mxu0 %v1696_v12  ;;  %1647 = vmatpush3.bf16.msra.mxu1 %v1696_v12  ;;  %v779_v15 = vld [vmem:[%s1902_s12] sm:$0xff]  ;;  %v780_v16 = vld [vmem:[%s1902_s12 + $0x8] sm:$0xff]  ;;  %v781_v17 = vld [vmem:[%s1902_s12 + $0x10] sm:$0xff] }
 0x121   : >> { %1602 = vmatprep.subr.bf16.mxu0 %v1697_v13  ;;  %1640 = vmatprep.subr.bf16.mxu1 %v1697_v13  ;;  %v782_v18 = vld [vmem:[%s1902_s12 + $0x18] sm:$0xff]  ;;  %v1908_v19 = vunpack.c.l.bf16 %v779_v15  ;;  %v1910_v20 = vunpack.c.h.bf16 %v779_v15  ;;  %v1912_v21 = vunpack.c.l.bf16 %v780_v16  ;;  %v1914_v22 = vunpack.c.h.bf16 %v780_v16  ;;  %v2010_v9 = vld [vmem:[%s1902_s12 + $0x20] sm:$0xff] }
 0x122   : >> { %v1916_v23 = vunpack.c.l.bf16 %v781_v17  ;;  %v1918_v24 = vunpack.c.h.bf16 %v781_v17  ;;  %v1920_v25 = vunpack.c.l.bf16 %v782_v18  ;;  %v1922_v26 = vunpack.c.h.bf16 %v782_v18 }
 0x123   : >> { %v798_v28 = vmul.f32 %v1927_v27, %v1908_v19  ;;  %v799_v29 = vmul.f32 %v1927_v27, %v1910_v20  ;;  %v800_v30 = vmul.f32 %v1927_v27, %v1912_v21  ;;  %v825_v31 = vrot.slane %v1908_v19, 7 }
 0x124   : >> { %1603 = vmatpush3.bf16.msra.mxu0 %v1697_v13  ;;  %1648 = vmatpush3.bf16.msra.mxu1 %v1697_v13  ;;  %v801_v33 = vmul.f32 %v1927_v27, %v1914_v22  ;;  %v802_v34 = vmul.f32 %v1927_v27, %v1916_v23  ;;  %v803_v35 = vmul.f32 %v1927_v27, %v1918_v24  ;;  %v1946_v36 = vrot.slane %v1922_v26, 7  ;;  %v1701_v13 = vld [vmem:[%s2299_s4 + $0x30] sm:$0xff]  }
 0x125   : >> { %1604 = vmatprep.subr.bf16.mxu0 %v1698_v14  ;;  %1641 = vmatprep.subr.bf16.mxu1 %v1698_v14  ;;  %v826_v37 = vrot.slane %v1910_v20, 7  ;;  %v1950_v38 = vrot.slane %v1912_v21, 7  ;;  %v830_v39 = vrot.slane %v1914_v22, 7  ;;  %v1954_v40 = vrot.slane %v1916_v23, 7 }
 0x126   : >> { %v834_v50 = vrot.slane %v1918_v24, 7  ;;  %v847_v52 = vsel %vm824_vm8, %v1946_v36, %v825_v31  ;;  %v894_v53 = vrot.slane %v1908_v19, 1  ;;  %v895_v54 = vrot.slane %v1910_v20, 1 }
 0x127   : >> { %v827_v55 = vsel %vm824_vm8, %v825_v31, %v826_v37  ;;  %v829_v56 = vsel %vm824_vm8, %v826_v37, %v1950_v38  ;;  %v1971_v57 = vsel %vm824_vm8, %v1950_v38, %v830_v39  ;;  %v864_v58 = vsel %vm1813_vm0, %v847_v52, 0.0 }
 0x128   : >> { %1605 = vmatpush3.bf16.msra.mxu0 %v1698_v14  ;;  %1649 = vmatpush3.bf16.msra.mxu1 %v1698_v14  ;;  %v1980_v60 = vsel %vm824_vm8, %v830_v39, %v1954_v40  ;;  %v1986_v61 = vsel %vm824_vm8, %v1954_v40, %v834_v50  ;;  %v866_v62 = vsel %vm1817_vm1, %v829_v56, 0.0  ;;  %v877_v63 = vmul.f32 %v1959_v41, %v864_v58 }
 0x129   : >> { %1606 = vmatprep.subr.bf16.mxu0 %v1699_v32  ;;  %1642 = vmatprep.subr.bf16.mxu1 %v1699_v32  ;;  %v868_v0 = vsel %vm1825_vm3, %v1980_v60, 0.0  ;;  %v878_v1 = vmul.f32 %v1959_v41, %v827_v55  ;;  %v879_v2 = vmul.f32 %v1959_v41, %v866_v62  ;;  %v880_v3 = vmul.f32 %v1959_v41, %v1971_v57 }
 0x12a   : >> { %v881_v4 = vmul.f32 %v1959_v41, %v868_v0  ;;  %v882_v5 = vmul.f32 %v1959_v41, %v1986_v61  ;;  %v885_v6 = vadd.f32 %v877_v63, %v798_v28  ;;  %v896_v7 = vsel %vm893_vm9, %v894_v53, %v895_v54 }
 0x12b   : >> { %v886_v10 = vadd.f32 %v878_v1, %v799_v29  ;;  %v887_v11 = vadd.f32 %v879_v2, %v800_v30  ;;  %v888_v51 = vadd.f32 %v880_v3, %v801_v33  ;;  %v2013_v12 = vrot.slane %v1912_v21, 1  ;;  %v2069_v2 = vld [vmem:[%s2298_s3 + $0x3] ss:$0 sm:$0xff] }
 0x12c   : >> { %1607 = vmatpush3.bf16.msra.mxu0 %v1699_v32  ;;  %1650 = vmatpush3.bf16.msra.mxu1 %v1699_v32  ;;  %v889_v14 = vadd.f32 %v881_v4, %v802_v34  ;;  %v890_v15 = vadd.f32 %v882_v5, %v803_v35  ;;  %v899_v16 = vrot.slane %v1914_v22, 1  ;;  %v2020_v17 = vrot.slane %v1916_v23, 1  ;;  %v2039_v34 = vld [vmem:[%s2298_s3 + $0x4] ss:$0 sm:$0xff] }
 0x12d   : >> { %1608 = vmatprep.subr.bf16.mxu0 %v1700_v59  ;;  %1643 = vmatprep.subr.bf16.mxu1 %v1700_v59  ;;  %v898_v18 = vsel %vm893_vm9, %v895_v54, %v2013_v12  ;;  %v903_v20 = vrot.slane %v1918_v24, 1  ;;  %v905_v28 = vrot.slane %v1920_v25, 1  ;;  %v948_v29 = vmul.f32 %v2007_v8, %v896_v7  ;;  %v1702_v54 = vld [vmem:[%s2299_s4 + $0x38] sm:$0xff]  }
 0x12e   : >> { %v900_v30 = vsel %vm893_vm9, %v2013_v12, %v899_v16  ;;  %v902_v31 = vsel %vm893_vm9, %v899_v16, %v2020_v17  ;;  %v936_v32 = vsel %vm1821_vm2, %v898_v18, 0.0  ;;  %v2034_v33 = vunpack.c.h.bf16 %v2010_v9 }
 0x12f   : >> { %v2043_v35 = vsel %vm893_vm9, %v2020_v17, %v903_v20  ;;  %v2048_v37 = vsel %vm893_vm9, %v903_v20, %v905_v28  ;;  %v938_v39 = vsel %vm1833_vm5, %v902_v31, 0.0  ;;  %v949_v52 = vmul.f32 %v2007_v8, %v936_v32  ;;  %v2099_v32 = vld [vmem:[%s1902_s12 + $0x28] sm:$0xff] }
 0x130   : >> { %1609 = vmatpush3.bf16.msra.mxu0 %v1700_v59  ;;  %1651 = vmatpush3.bf16.msra.mxu1 %v1700_v59  ;;  %v940_v55 = vsel %vm1837_vm6, %v2048_v37, 0.0  ;;  %v950_v56 = vmul.f32 %v2007_v8, %v900_v30  ;;  %v951_v58 = vmul.f32 %v2007_v8, %v938_v39  ;;  %v952_v59 = vmul.f32 %v2007_v8, %v2043_v35 }
 0x131   : >> { %1610 = vmatprep.subr.bf16.mxu0 %v1701_v13  ;;  %1644 = vmatprep.subr.bf16.mxu1 %v1701_v13  ;;  %v953_v62 = vmul.f32 %v2007_v8, %v940_v55  ;;  %v956_v63 = vadd.f32 %v948_v29, %v885_v6  ;;  %v957_v0 = vadd.f32 %v949_v52, %v886_v10  ;;  %v2082_v16 = vrot.slane %v2034_v33, 7  ;;  %v2110_v55 = vld [vmem:[%s2298_s3 + $0x7] ss:$0 sm:$0xff] }
 0x132   : >> { %v971_v1 = vmul.f32 %v2039_v34, %v1912_v21  ;;  %v958_v3 = vadd.f32 %v950_v56, %v887_v11  ;;  %v959_v4 = vadd.f32 %v951_v58, %v888_v51  ;;  %v2071_v5 = vadd.f32 %v952_v59, %v889_v14  ;;  %v2092_v14 = vld [vmem:[%s2298_s3 + $0x5] ss:$0 sm:$0xff] }
 0x133   : >> { %v972_v7 = vmul.f32 %v2039_v34, %v1914_v22  ;;  %v2075_v6 = vadd.f32 %v953_v62, %v890_v15  ;;  %v973_v21 = vmul.f32 %v2039_v34, %v1916_v23  ;;  %v974_v10 = vmul.f32 %v2039_v34, %v1918_v24 }
 0x134   : >> { %1611 = vmatpush3.bf16.msra.mxu0 %v1701_v13  ;;  %1652 = vmatpush3.bf16.msra.mxu1 %v1701_v13  ;;  %v979_v11 = vadd.f32 %v971_v1, %v956_v63  ;;  %v1000_v22 = vsel %vm1817_vm1, %v1980_v60, 0.0  ;;  %v1012_v13 = vmul.f32 %v2069_v2, %v1971_v57  ;;  %v997_v20 = vsel %vm824_vm8, %v2082_v16, %v1950_v38  ;;  %v2133_v1 = vld [vmem:[%s2298_s3 + $0x8] ss:$0 sm:$0xff] }
 0x135   : >> { %1612 = vmatprep.subr.bf16.mxu0 %v1702_v54  ;;  %1645 = vmatprep.subr.bf16.mxu1 %v1702_v54  ;;  %v980_v51 = vadd.f32 %v972_v7, %v957_v0  ;;  %v981_v15 = vadd.f32 %v973_v21, %v958_v3  ;;  %v982_v18 = vadd.f32 %v974_v10, %v959_v4  ;;  %v998_v60 = vsel %vm1813_vm0, %v997_v20, 0.0 }
 0x136   : >> { %v1013_v29 = vmul.f32 %v2069_v2, %v1000_v22  ;;  %v1014_v57 = vmul.f32 %v2069_v2, %v1986_v61  ;;  %v1037_v52 = vsel %vm1821_vm2, %v902_v31, 0.0  ;;  %v1011_v38 = vmul.f32 %v2069_v2, %v998_v60  ;;  %v2120_v31 = vld [vmem:[%s2298_s3 + $0x6] ss:$0 sm:$0xff] }
 0x137   : >> { %v1020_v39 = vadd.f32 %v1012_v13, %v980_v51  ;;  %v1039_v58 = vsel %vm1833_vm5, %v2048_v37, 0.0  ;;  %v1049_v59 = vmul.f32 %v2092_v14, %v900_v30  ;;  %v1050_v63 = vmul.f32 %v2092_v14, %v1037_v52 }
 0x138   : >> { %1613 = vmatpush3.bf16.msra.mxu0 %v1702_v54  ;;  %1653 = vmatpush3.bf16.msra.mxu1 %v1702_v54  ;;  %v1021_v56 = vadd.f32 %v1013_v29, %v981_v15  ;;  %v2122_v62 = vadd.f32 %v1014_v57, %v982_v18  ;;  %v1051_v54 = vmul.f32 %v2092_v14, %v2043_v35  ;;  %v2136_v3 = vunpack.c.h.bf16 %v2099_v32 }
 0x139   : >> { %v2128_v0 = vmul.f32 %v2092_v14, %v1039_v58  ;;  %v1019_v30 = vadd.f32 %v1011_v38, %v979_v11  ;;  %v1072_v4 = vmul.f32 %v2110_v55, %v1916_v23  ;;  %v1073_v7 = vmul.f32 %v2110_v55, %v1918_v24 }
 0x13a   : >> { %v1058_v21 = vadd.f32 %v1050_v63, %v1020_v39  ;;  %v2142_v10 = vadd.f32 %v1051_v54, %v1021_v56  ;;  %v1113_v51 = vmul.f32 %v2120_v31, %v1986_v61  ;;  %v1138_v22 = vsel %vm1821_vm2, %v2048_v37, 0.0 }
 0x13b   : >> { %v1057_v11 = vadd.f32 %v1049_v59, %v1019_v30  ;;  %v1089_v13 = vrot.slane %v2136_v3, 7  ;;  %v1150_v15 = vmul.f32 %v2133_v1, %v2043_v35  ;;  %v1151_v23 = vmul.f32 %v2133_v1, %v1138_v22 }
 0x13c   : >> { %v1081_v18 = vadd.f32 %v1073_v7, %v1058_v21  ;;  %v804_v20 = vmul.f32 %v1927_v27, %v1920_v25  ;;  %v805_v29 = vmul.f32 %v1927_v27, %v1922_v26  ;;  %v836_v61 = vrot.slane %v1920_v25, 7 }
 0x13d   : >> { %v1080_v60 = vadd.f32 %v1072_v4, %v1057_v11  ;;  %v1098_v37 = vsel %vm824_vm8, %v1089_v13, %v1954_v40  ;;  %v907_v57 = vrot.slane %v1922_v26, 1  ;;  %v964_v35 = vunpack.c.l.bf16 %v2010_v9 }
 0x13e   : >> { %v1099_v39 = vsel %vm1813_vm0, %v1098_v37, 0.0  ;;  %v1121_v52 = vadd.f32 %v1113_v51, %v1081_v18  ;;  %v2169_v27 = vsel %vm824_vm8, %v834_v50, %v836_v61  ;;  %v2173_v38 = vsel %vm824_vm8, %v836_v61, %v1946_v36 }
 0x13f   : >> { %v1112_v56 = vmul.f32 %v2120_v31, %v1099_v39  ;;  %v870_v40 = vsel %vm1829_vm4, %v2169_v27, 0.0  ;;  %v884_v9 = vmul.f32 %v1959_v41, %v2173_v38  ;;  %v2184_v24 = vsel %vm893_vm9, %v905_v28, %v907_v57 }
 0x140   : >> { %v1159_v50 = vadd.f32 %v1151_v23, %v1121_v52  ;;  %v883_v58 = vmul.f32 %v1959_v41, %v870_v40  ;;  %v918_v59 = vsel %vm893_vm9, %v907_v57, %v894_v53  ;;  %v954_v63 = vmul.f32 %v2007_v8, %v2184_v24 }
 0x141   : >> { %v1120_v54 = vadd.f32 %v1112_v56, %v1080_v60  ;;  %v892_v30 = vadd.f32 %v884_v9, %v805_v29  ;;  %v942_v4 = vsel %vm1841_vm7, %v918_v59, 0.0  ;;  %v975_v7 = vmul.f32 %v2039_v34, %v1920_v25 }
 0x142   : >> { %v891_v28 = vadd.f32 %v883_v58, %v804_v20  ;;  %v955_v21 = vmul.f32 %v2007_v8, %v942_v4  ;;  %v976_v41 = vmul.f32 %v2039_v34, %v1922_v26  ;;  %v977_v19 = vmul.f32 %v2039_v34, %v964_v35 }
 0x143   : >> { %v1158_v53 = vadd.f32 %v1150_v15, %v1120_v54  ;;  %v978_v51 = vmul.f32 %v2039_v34, %v2034_v33  ;;  %v983_v22 = vadd.f32 %v975_v7, %v2071_v5  ;;  %v991_v11 = vrot.slane %v964_v35, 7 }
 0x144   : >> { %v962_v23 = vadd.f32 %v954_v63, %v891_v28  ;;  %v963_v18 = vadd.f32 %v955_v21, %v892_v30  ;;  %v984_v29 = vadd.f32 %v976_v41, %v2075_v6  ;;  %v1002_v8 = vsel %vm1825_vm3, %v2169_v27, 0.0 }
 0x145   : >> { %v1166_v20 = vpack.c.bf16 %v1159_v50, %v1158_v53  ;;  %v992_v61 = vsel %vm824_vm8, %v1946_v36, %v991_v11  ;;  %v993_v15 = vsel %vm824_vm8, %v991_v11, %v2082_v16  ;;  %v1015_v34 = vmul.f32 %v2069_v2, %v1002_v8 }
 0x146   : >> { %v985_v60 = vadd.f32 %v977_v19, %v962_v23  ;;  %v986_v5 = vadd.f32 %v978_v51, %v963_v18  ;;  %v1004_v37 = vsel %vm1829_vm4, %v992_v61, 0.0  ;;  %v1016_v6 = vmul.f32 %v2069_v2, %v2173_v38 }
 0x147   : >> { %1614 = vmatprep.mubr.bf16.mxu0 %v1166_v20  ;;  %v1017_v39 = vmul.f32 %v2069_v2, %v1004_v37  ;;  %v1018_v52 = vmul.f32 %v2069_v2, %v993_v15  ;;  %v1023_v56 = vadd.f32 %v1015_v34, %v983_v22  ;;  %v1027_v36 = vrot.slane %v964_v35, 1 }
 0x148   : >> { %v1024_v40 = vadd.f32 %v1016_v6, %v984_v29  ;;  %v1029_v9 = vrot.slane %v2034_v33, 1  ;;  %v1053_v50 = vmul.f32 %v2092_v14, %v2184_v24  ;;  %v1065_v58 = vunpack.c.l.bf16 %v2099_v32 }
 0x149   : >> { %v1025_v59 = vadd.f32 %v1017_v39, %v985_v60  ;;  %v1026_v63 = vadd.f32 %v1018_v52, %v986_v5  ;;  %v1028_v54 = vsel %vm893_vm9, %v907_v57, %v1027_v36  ;;  %v1076_v30 = vmul.f32 %v2110_v55, %v964_v35 }
 0x14a   : >> { %v1030_v4 = vsel %vm893_vm9, %v1027_v36, %v1029_v9  ;;  %v1035_v2 = vsel %vm893_vm9, %v1029_v9, %v2013_v12  ;;  %v1041_v7 = vsel %vm1837_vm6, %v1028_v54, 0.0  ;;  %v1061_v28 = vadd.f32 %v1053_v50, %v1023_v56 }
 0x14b   : >> { %v1043_v21 = vsel %vm1841_vm7, %v1035_v2, 0.0  ;;  %v1054_v32 = vmul.f32 %v2092_v14, %v1041_v7  ;;  %v1055_v41 = vmul.f32 %v2092_v14, %v1030_v4  ;;  %v1077_v57 = vmul.f32 %v2110_v55, %v2034_v33 }
 0x14c   : >> { %v1084_v35 = vadd.f32 %v1076_v30, %v1061_v28  ;;  %v1103_v19 = vsel %vm1825_vm3, %v992_v61, 0.0  ;;  %v1117_v12 = vmul.f32 %v2120_v31, %v993_v15  ;;  %v1128_v53 = vrot.slane %v1065_v58, 1 }
 0x14d   : >> { %v1062_v51 = vadd.f32 %v1054_v32, %v1024_v40  ;;  %v1063_v22 = vadd.f32 %v1055_v41, %v1025_v59  ;;  %v1116_v11 = vmul.f32 %v2120_v31, %v1103_v19  ;;  %v1154_v23 = vmul.f32 %v2133_v1, %v1030_v4 }
 0x14e   : >> { %v1129_v18 = vsel %vm893_vm9, %v1029_v9, %v1128_v53  ;;  %v1060_v29 = vadd.f32 %v2128_v0, %v2122_v62  ;;  %v1074_v33 = vmul.f32 %v2110_v55, %v1920_v25  ;;  %v1075_v8 = vmul.f32 %v2110_v55, %v1922_v26 }
 0x14f   : >> { %v1085_v20 = vadd.f32 %v1077_v57, %v1062_v51  ;;  %v1124_v61 = vadd.f32 %v1116_v11, %v1084_v35  ;;  %v1142_v15 = vsel %vm1837_vm6, %v1129_v18, 0.0  ;;  %v1101_v34 = vsel %vm1817_vm1, %v2169_v27, 0.0 }
 0x150   : >> { %v1155_v60 = vmul.f32 %v2133_v1, %v1142_v15  ;;  %v1082_v5 = vadd.f32 %v1074_v33, %v2142_v10  ;;  %v1083_v62 = vadd.f32 %v1075_v8, %v1060_v29  ;;  %v1114_v0 = vmul.f32 %v2120_v31, %v1101_v34 }
 0x151   : >> { %v1125_v25 = vadd.f32 %v1117_v12, %v1085_v20  ;;  %v1162_v37 = vadd.f32 %v1154_v23, %v1124_v61  ;;  %v1115_v26 = vmul.f32 %v2120_v31, %v2173_v38  ;;  %v1140_v6 = vsel %vm1833_vm5, %v1028_v54, 0.0 }
 0x152   : >> { %v1122_v39 = vadd.f32 %v1114_v0, %v1082_v5  ;;  %v1152_v52 = vmul.f32 %v2133_v1, %v2184_v24  ;;  %v1153_v27 = vmul.f32 %v2133_v1, %v1140_v6  ;;  %v1056_v56 = vmul.f32 %v2092_v14, %v1043_v21 }
 0x153   : >> { %v1163_v10 = vadd.f32 %v1155_v60, %v1125_v25  ;;  %v1123_v36 = vadd.f32 %v1115_v26, %v1083_v62  ;;  %v1078_v40 = vmul.f32 %v2110_v55, %v1065_v58  ;;  %v1079_v9 = vmul.f32 %v2110_v55, %v2136_v3 }
 0x154   : >> { %v1160_v50 = vadd.f32 %v1152_v52, %v1122_v39  ;;  %v1064_v38 = vadd.f32 %v1056_v56, %v1026_v63  ;;  %v1092_v59 = vrot.slane %v1065_v58, 7  ;;  %v1130_v54 = vrot.slane %v2136_v3, 1 }
 0x155   : >> { %v1168_v30 = vpack.c.bf16 %v1163_v10, %v1162_v37  ;;  %v1161_v4 = vadd.f32 %v1153_v27, %v1123_v36  ;;  %v1086_v2 = vadd.f32 %v1078_v40, %v1063_v22 }
 0x156   : >> { %v1087_v24 = vadd.f32 %v1079_v9, %v1064_v38  ;;  %v1093_v7 = vsel %vm824_vm8, %v2082_v16, %v1092_v59  ;;  %v1094_v14 = vsel %vm824_vm8, %v1092_v59, %v1089_v13  ;;  %v1131_v28 = vsel %vm893_vm9, %v1128_v53, %v1130_v54 }
 0x157   : >> { %1618 = vmatprep.mubr.bf16.mxu1 %v1168_v30  ;;  %v1167_v55 = vpack.c.bf16 %v1161_v4, %v1160_v50  ;;  %v1105_v58 = vsel %vm1829_vm4, %v1093_v7, 0.0  ;;  %v1119_v63 = vmul.f32 %v2120_v31, %v1094_v14  ;;  %v1136_v21 = vsel %vm893_vm9, %v1130_v54, %v2020_v17  ;;  %v1458_v17 = vld [vmem:[%s2300_s5] ss:$0 sm:$0xff] }
 0x158   : >> { %v1118_v32 = vmul.f32 %v2120_v31, %v1105_v58  ;;  %v1144_v16 = vsel %vm1841_vm7, %v1136_v21, 0.0  ;;  %v1156_v3 = vmul.f32 %v2133_v1, %v1131_v28 }
 0x159   : >> { %1615 = vmatmul.mubr.bf16.vlgmr.msra.gmra.mrb[0].mxu0 %v1167_v55  ;;  %v1127_v13 = vadd.f32 %v1119_v63, %v1087_v24  ;;  %v1157_v41 = vmul.f32 %v2133_v1, %v1144_v16 }
 0x15a   : >> { %v1126_v57 = vadd.f32 %v1118_v32, %v1086_v2 }
 0x15b   : >> { %v1165_v35 = vadd.f32 %v1157_v41, %v1127_v13 }
 0x15c   : >> { %v1164_v19 = vadd.f32 %v1156_v3, %v1126_v57 }
 0x15e   : >> { %v1169_v12 = vpack.c.bf16 %v1165_v35, %v1164_v19 }
 0x160   : >> { %1619 = vmatmul.mubr.bf16.vlgmr.msra.gmra.mrb[0].mxu1 %v1169_v12 }
 0x22c   : >> { %v1616_v53 = vpop.f32.mrb[0].mxu0 }
 0x22d   : >> { %v1275_v31 = vpop.f32.mrb[1].mxu0  ;;  %v1284_v22 = vadd.f32 %v1616_v53, %v1458_v17 }
 0x22e   : >> { %v1617_v51 = vpop.f32.mrb[2].mxu0  ;;  %v1276_v18 = vadd.f32 %v1458_v17, %v1275_v31 }
 0x22f   : >> { %v1287_v11 = vadd.f32 %v1617_v51, %v1458_v17  ;;  %v1278_v23 = vpop.f32.mrb[3].mxu0 }
 0x230   : >> { %v1279_v29 = vadd.f32 %v1458_v17, %v1278_v23 }
 0x231   : >> { %v1499_v1 = vpack.c.bf16 %v1287_v11, %v1284_v22 }
 0x232   : >> { %v1494_v33 = vpack.c.bf16 %v1279_v29, %v1276_v18 }
 0x233   : >> { %v1620_v8 = vpop.f32.mrb[0].mxu1  ;;  %1511 = vst [vmem:[%s1340_s22 + $0x8] sm:$0xff] %v1499_v1  }
 0x234   : >> { %v1291_v20 = vpop.f32.mrb[1].mxu1  ;;  %1495 = vst [vmem:[%s1340_s22] sm:$0xff] %v1494_v33   ;;  %v1300_v15 = vadd.f32 %v1620_v8, %v1458_v17 }
 0x235   : >> { %v1621_v61 = vpop.f32.mrb[2].mxu1  ;;  %v1292_v5 = vadd.f32 %v1458_v17, %v1291_v20  ;;  %774 = sbr.rel (!%p772_p4) target bundleno = 282 (0x11a), region = 85 }
 0x236   : >> { %v1303_v34 = vadd.f32 %v1621_v61, %v1458_v17  ;;  %v1294_v60 = vpop.f32.mrb[3].mxu1 }
 0x237   : >> { %v1295_v62 = vadd.f32 %v1458_v17, %v1294_v60 }
 0x238   : >> { %v1509_v0 = vpack.c.bf16 %v1303_v34, %v1300_v15 }
 0x239   : >> { %v1504_v25 = vpack.c.bf16 %v1295_v62, %v1292_v5 }
 0x23a   : >> { %1513 = vst [vmem:[%s1340_s22 + $0x18] sm:$0xff] %v1509_v0  }
 0x23b   : >> { %1512 = vst [vmem:[%s1340_s22 + $0x10] sm:$0xff] %v1504_v25  }
 0x23c PF: > { %s16_s21 = sadd.s32 1, %s1713_s21  }
 0x23d   : > { %p13_p5 = scmp.ge.s32.totalorder %s16_s21, 6  }
 0x23f   :  { %15 = sbr.rel (!%p13_p5) target bundleno = 1 (0x1), region = 96 }

</bundles_post_ra>
